<compile_context>
chip_gen: v7x
topology: tpu7x:2x2x1
jax: 0.10.0
libtpu: 0.0.40
codegen_flags: <defaults>
</compile_context>

<pallas_src>
import functools

import jax
import jax.numpy as jnp
import numpy as np
from jax.experimental import pallas as pl
from jax.experimental.pallas import tpu as pltpu


def _fused_kernel(alpha_ref, w1_ref, w2_ref, w3_ref, p_ref, out_ref):
    """One grid step = TB batch elements, lane-concatenated.

    p_ref:   (1, K*K+1, TB*Lp)  im2col patches; last row = ones (bias carrier)
    w1_ref:  (12, K*K+1) rows 0:10 [conv1 w | b1], row 10 [0 | 1], row 11 [gauss | 0]
    w2_ref:  (11, 11)    rows 0:10 [conv2 w | b2], row 10 [0 | 1]
    w3_ref:  (1, 11)     [conv3 w | b3]
    out_ref: (1, 2, TB*Lp)  row 0 = match, row 1 = estimate
    """
    prec = jax.lax.Precision.HIGHEST
    alpha = alpha_ref[0]                                   # shared PReLU scalar
    patches = p_ref[0]                                     # (KK+1, TB*Lp)

    # conv1(KxK,1->10)+bias, gaussian estimator and ones-carrier: ONE MXU pass.
    h12 = jnp.dot(w1_ref[...], patches, precision=prec,
                  preferred_element_type=jnp.float32)      # (12, TB*Lp)
    est = h12[11:12]                                       # raw gaussian conv
    h = h12[0:11]                                          # 10 features + ones row
    h = jnp.where(h >= 0, h, alpha * h)                    # PReLU (ones row: 1 -> 1)

    # conv2 (1x1, 10->10) + bias; ones row carried through for conv3's bias.
    h = jnp.dot(w2_ref[...], h, precision=prec,
                preferred_element_type=jnp.float32)        # (11, TB*Lp)
    h = jnp.where(h >= 0, h, alpha * h)

    # conv3 (1x1, 10->1) + bias.
    m = jnp.dot(w3_ref[...], h, precision=prec,
                preferred_element_type=jnp.float32)        # (1, TB*Lp)
    m = jnp.where(m >= 0, m, alpha * m)

    out_ref[0, 0:1, :] = m                                 # match
    out_ref[0, 1:2, :] = est                               # estimate


def estimator_submodule_forward(x, params, *, kernel, max_kernel, batch_tile=None):
    """x: (N, 1, H, W) f32 -> (match (N,1,Ho,Wo), estimate (N,1,Ho,Wo))."""
    n, cin, h, w = x.shape
    assert cin == 1
    k = kernel
    kk = k * k
    rm = int((max_kernel - k) / 2)
    hc, wc = h - 2 * rm, w - 2 * rm
    hout, wout = hc - k + 1, wc - k + 1
    lv = hout * wout                              # valid output columns / element
    lp = pl.cdiv(lv, 128) * 128                   # lane-dense per-element width

    # Batch tile: amortize the ~0.35us/step overhead but keep grid length >= 2
    # so both v7x TensorCores get work ("parallel" leading axis).
    if batch_tile is None:
        batch_tile = max(1, min(8, n // 2))
    tb = batch_tile
    g = pl.cdiv(n, tb)
    npad = g * tb
    cols = tb * lp

    xf = x.astype(jnp.float32)
    xc = xf[:, 0, rm:h - rm, rm:w - rm]           # crop (as in the torch module)

    # im2col in the wrapper (plain XLA): tap (ky,kx) -> one row of the slab.
    taps = [xc[:, ky:ky + hout, kx:kx + wout].reshape(n, 1, lv)
            for ky in range(k) for kx in range(k)]
    patches = jnp.concatenate(taps, axis=1)                       # (N, KK, Lv)
    patches = jnp.pad(patches, ((0, npad - n), (0, 0), (0, lp - lv)))
    ones = jnp.ones((npad, 1, lp), jnp.float32)                   # bias carrier
    patches = jnp.concatenate([patches, ones], axis=1)            # (Np, KK+1, Lp)
    # Lane-concatenate TB elements per grid step: (G, KK+1, TB*Lp).
    patches = patches.reshape(g, tb, kk + 1, lp).transpose(0, 2, 1, 3)
    patches = patches.reshape(g, kk + 1, cols)

    # Fused weight matrices (biases folded into the MXU, estimator fused in).
    w1f = params["w1"].reshape(10, kk).astype(jnp.float32)
    wef = params["west"].reshape(1, kk).astype(jnp.float32)
    w1big = jnp.zeros((12, kk + 1), jnp.float32)
    w1big = w1big.at[0:10, 0:kk].set(w1f)
    w1big = w1big.at[0:10, kk].set(params["b1"].astype(jnp.float32))
    w1big = w1big.at[10, kk].set(1.0)                  # ones-carrier row
    w1big = w1big.at[11, 0:kk].set(wef[0])             # gaussian estimator row

    w2big = jnp.zeros((11, 11), jnp.float32)
    w2big = w2big.at[0:10, 0:10].set(params["w2"][:, :, 0, 0].astype(jnp.float32))
    w2big = w2big.at[0:10, 10].set(params["b2"].astype(jnp.float32))
    w2big = w2big.at[10, 10].set(1.0)                  # keep carrying the ones row

    w3big = jnp.zeros((1, 11), jnp.float32)
    w3big = w3big.at[0, 0:10].set(
        params["w3"][:, :, 0, 0].reshape(10).astype(jnp.float32))
    w3big = w3big.at[0, 10].set(params["b3"].reshape(())[()].astype(jnp.float32))

    alpha = jnp.reshape(jnp.asarray(params["alpha"], jnp.float32), (1,))

    def fixed(*shape):  # full-block, grid-invariant operand (weights)
        nd = len(shape)
        return pl.BlockSpec(shape, lambda i: (0,) * nd)

    flops_step = (2 * 12 * (kk + 1) + 2 * 11 * 11 + 2 * 11 + 3 * 23) * cols
    bytes_step = 4 * ((kk + 1) * cols + 2 * cols)
    cost = pl.CostEstimate(
        flops=int(g * flops_step),
        transcendentals=0,
        bytes_accessed=int(g * bytes_step
                           + 4 * (12 * (kk + 1) + 11 * 11 + 11 + 1)))

    out = pl.pallas_call(
        _fused_kernel,
        out_shape=jax.ShapeDtypeStruct((g, 2, cols), jnp.float32),
        grid=(g,),
        in_specs=[
            pl.BlockSpec(memory_space=pltpu.MemorySpace.SMEM),   # PReLU alpha
            fixed(12, kk + 1),                                   # fused conv1/est/bias
            fixed(11, 11),                                       # fused conv2/bias
            fixed(1, 11),                                        # fused conv3/bias
            pl.BlockSpec((1, kk + 1, cols), lambda i: (i, 0, 0)),  # patches slab
        ],
        out_specs=pl.BlockSpec((1, 2, cols), lambda i: (i, 0, 0)),
        compiler_params=pltpu.CompilerParams(
            dimension_semantics=("parallel",),
            vmem_limit_bytes=32 * 1024 * 1024),
        cost_estimate=cost,
    )(alpha, w1big, w2big, w3big, patches)

    # (G, 2, TB*Lp) lane-concatenated -> (N, 2, Ho, Wo); layout plumbing only.
    out = out.reshape(g, 2, tb, lp).transpose(0, 2, 1, 3).reshape(npad, 2, lp)
    out = out[:n, :, :lv].reshape(n, 2, hout, wout)
    return out[:, 0:1], out[:, 1:2]


def init_params(key, ksize):
    """Deterministic parameters matching the PyTorch module's layers."""
    def conv_init(k, cout, cin, ks):
        kw, kb = jax.random.split(k)
        bound = 1.0 / np.sqrt(cin * ks * ks)
        wgt = jax.random.uniform(kw, (cout, cin, ks, ks), jnp.float32, -bound, bound)
        bia = jax.random.uniform(kb, (cout,), jnp.float32, -bound, bound)
        return wgt, bia

    k1, k2, k3 = jax.random.split(key, 3)
    w1, b1 = conv_init(k1, 10, 1, ksize)     # PatternMatcher.conv1
    w2, b2 = conv_init(k2, 10, 10, 1)        # PatternMatcher.conv2 (1x1)
    w3, b3 = conv_init(k3, 1, 10, 1)         # PatternMatcher.conv3 (1x1)
    alpha = jnp.asarray(0.25, jnp.float32)   # nn.PReLU() default, shared

    # EstimatorKernel: Conv2d(1,1,K,bias=False), kornia gaussian init
    # (sigma = K/3, 1-D kernels normalized to sum 1, outer product).
    sigma = ksize / 3.0
    g = np.exp(-((np.arange(ksize) - (ksize - 1) / 2.0) ** 2) / (2.0 * sigma ** 2))
    g = g / g.sum()
    west = jnp.asarray(np.outer(g, g), jnp.float32).reshape(1, 1, ksize, ksize)

    return dict(w1=w1, b1=b1, w2=w2, b2=b2, w3=w3, b3=b3, alpha=alpha, west=west)


def reference_forward(x, params, kernel, max_kernel):
    """Pure-JAX (lax.conv) reference for correctness checking."""
    rm = int((max_kernel - kernel) / 2)
    h, w = x.shape[2], x.shape[3]
    xc = x[:, :, rm:h - rm, rm:w - rm]

    def conv(v, wt):
        return jax.lax.conv_general_dilated(
            v, wt, (1, 1), "VALID",
            dimension_numbers=("NCHW", "OIHW", "NCHW"),
            precision=jax.lax.Precision.HIGHEST)

    a = params["alpha"]
    prelu = lambda t: jnp.where(t >= 0, t, a * t)
    m = prelu(conv(xc, params["w1"]) + params["b1"][None, :, None, None])
    m = prelu(conv(m, params["w2"]) + params["b2"][None, :, None, None])
    m = prelu(conv(m, params["w3"]) + params["b3"][None, :, None, None])
    est = conv(xc, params["west"])            # EstimatorKernel: no bias, no act
    return m, est


if __name__ == "__main__":
    KSIZE, MAX_KERNEL = 5, 9      # rm_size = 2: 16x16 -> crop 12x12 -> conv 8x8
    key = jax.random.PRNGKey(0)
    kx, kp = jax.random.split(key)
    x = jax.random.normal(kx, (2, 1, 16, 16), jnp.float32)
    params = init_params(kp, KSIZE)

    fwd = jax.jit(functools.partial(estimator_submodule_forward,
                                    kernel=KSIZE, max_kernel=MAX_KERNEL))
    match, estimate = jax.block_until_ready(fwd(x, params))

    assert match.shape == (2, 1, 8, 8), match.shape
    assert estimate.shape == (2, 1, 8, 8), estimate.shape

    ref_match, ref_est = reference_forward(x, params, KSIZE, MAX_KERNEL)
    np.testing.assert_allclose(np.asarray(match), np.asarray(ref_match),
                               rtol=1e-3, atol=1e-4)
    np.testing.assert_allclose(np.asarray(estimate), np.asarray(ref_est),
                               rtol=1e-3, atol=1e-4)
    print("KERNEL_OK")
</pallas_src>

<mosaic_0001>
module attributes {stable_mosaic.version = 11 : i64} {
  func.func @_fused_kernel(%arg0: i32, %arg1: memref<1xf32, #tpu.memory_space<smem>>, %arg2: memref<12x26xf32, #tpu.memory_space<vmem>>, %arg3: memref<11x11xf32, #tpu.memory_space<vmem>>, %arg4: memref<1x11xf32, #tpu.memory_space<vmem>>, %arg5: memref<1x26x128xf32, #tpu.memory_space<vmem>>, %arg6: memref<1x2x128xf32, #tpu.memory_space<vmem>>) attributes {dimension_semantics = [#tpu.dimension_semantics<parallel>], iteration_bounds = array<i64: 2>, scalar_prefetch = 0 : i64, scratch_operands = 0 : i64, tpu.core_type = #tpu.core_type<tc>, window_params = [{transform_indices = @transform_0, window_bounds = array<i64: 1>}, {pipeline_mode = #tpu.pipeline_mode<synchronous>, transform_indices = @transform_1, window_bounds = array<i64: 12, 26>}, {pipeline_mode = #tpu.pipeline_mode<synchronous>, transform_indices = @transform_2, window_bounds = array<i64: 11, 11>}, {pipeline_mode = #tpu.pipeline_mode<synchronous>, transform_indices = @transform_3, window_bounds = array<i64: 1, 11>}, {transform_indices = @transform_4, window_bounds = array<i64: 1, 26, 128>}, {transform_indices = @transform_5, window_bounds = array<i64: 1, 2, 128>}]} {
    %c0 = arith.constant 0 : index
    %0 = memref.load %arg1[%c0] : memref<1xf32, #tpu.memory_space<smem>>
    %c0_0 = arith.constant 0 : index
    %c0_1 = arith.constant 0 : index
    %c0_2 = arith.constant 0 : index
    %1 = vector.load %arg5[%c0_0, %c0_1, %c0_2] : memref<1x26x128xf32, #tpu.memory_space<vmem>>, vector<1x26x128xf32>
    %2 = vector.shape_cast %1 : vector<1x26x128xf32> to vector<26x128xf32>
    %c0_3 = arith.constant 0 : index
    %c0_4 = arith.constant 0 : index
    %3 = vector.load %arg2[%c0_3, %c0_4] : memref<12x26xf32, #tpu.memory_space<vmem>>, vector<12x26xf32>
    %cst = arith.constant dense<0.000000e+00> : vector<12x128xf32>
    %4 = tpu.matmul %3, %2, %cst {dimension_numbers = #tpu.dot_dimension_numbers<[1], [0], [0], [1], [0, 0, 1, 1], [], []>, precision = #tpu.contract_precision<fp32>} : vector<12x26xf32>, vector<26x128xf32>, vector<12x128xf32> -> vector<12x128xf32>
    %5 = vector.extract_strided_slice %4 {offsets = [11, 0], sizes = [1, 128], strides = [1, 1]} : vector<12x128xf32> to vector<1x128xf32>
    %6 = vector.extract_strided_slice %4 {offsets = [0, 0], sizes = [11, 128], strides = [1, 1]} : vector<12x128xf32> to vector<11x128xf32>
    %cst_5 = arith.constant 0.000000e+00 : f32
    %7 = vector.broadcast %cst_5 : f32 to vector<11x128xf32>
    %8 = arith.cmpf oge, %6, %7 : vector<11x128xf32>
    %9 = vector.broadcast %0 : f32 to vector<11x128xf32>
    %10 = arith.mulf %9, %6 : vector<11x128xf32>
    %11 = arith.select %8, %6, %10 : vector<11x128xi1>, vector<11x128xf32>
    %c0_6 = arith.constant 0 : index
    %c0_7 = arith.constant 0 : index
    %12 = vector.load %arg3[%c0_6, %c0_7] : memref<11x11xf32, #tpu.memory_space<vmem>>, vector<11x11xf32>
    %cst_8 = arith.constant dense<0.000000e+00> : vector<11x128xf32>
    %13 = tpu.matmul %12, %11, %cst_8 {dimension_numbers = #tpu.dot_dimension_numbers<[1], [0], [0], [1], [0, 0, 1, 1], [], []>, precision = #tpu.contract_precision<fp32>} : vector<11x11xf32>, vector<11x128xf32>, vector<11x128xf32> -> vector<11x128xf32>
    %cst_9 = arith.constant 0.000000e+00 : f32
    %14 = vector.broadcast %cst_9 : f32 to vector<11x128xf32>
    %15 = arith.cmpf oge, %13, %14 : vector<11x128xf32>
    %16 = vector.broadcast %0 : f32 to vector<11x128xf32>
    %17 = arith.mulf %16, %13 : vector<11x128xf32>
    %18 = arith.select %15, %13, %17 : vector<11x128xi1>, vector<11x128xf32>
    %c0_10 = arith.constant 0 : index
    %c0_11 = arith.constant 0 : index
    %19 = vector.load %arg4[%c0_10, %c0_11] : memref<1x11xf32, #tpu.memory_space<vmem>>, vector<1x11xf32>
    %cst_12 = arith.constant dense<0.000000e+00> : vector<1x128xf32>
    %20 = tpu.matmul %19, %18, %cst_12 {dimension_numbers = #tpu.dot_dimension_numbers<[1], [0], [0], [1], [0, 0, 1, 1], [], []>, precision = #tpu.contract_precision<fp32>} : vector<1x11xf32>, vector<11x128xf32>, vector<1x128xf32> -> vector<1x128xf32>
    %cst_13 = arith.constant 0.000000e+00 : f32
    %21 = vector.broadcast %cst_13 : f32 to vector<1x128xf32>
    %22 = arith.cmpf oge, %20, %21 : vector<1x128xf32>
    %23 = vector.broadcast %0 : f32 to vector<1x128xf32>
    %24 = arith.mulf %23, %20 : vector<1x128xf32>
    %25 = arith.select %22, %20, %24 : vector<1x128xi1>, vector<1x128xf32>
    %c0_14 = arith.constant 0 : index
    %c0_15 = arith.constant 0 : index
    %c0_16 = arith.constant 0 : index
    %26 = vector.load %arg6[%c0_14, %c0_15, %c0_16] : memref<1x2x128xf32, #tpu.memory_space<vmem>>, vector<1x1x128xf32>
    %27 = vector.shape_cast %26 : vector<1x1x128xf32> to vector<1x128xf32>
    %28 = vector.shape_cast %25 : vector<1x128xf32> to vector<1x1x128xf32>
    tpu.vector_store %arg6[%c0_14, %c0_15, %c0_16], %28 {strides = array<i32>} : memref<1x2x128xf32, #tpu.memory_space<vmem>>, vector<1x1x128xf32>,
    %c0_17 = arith.constant 0 : index
    %c1 = arith.constant 1 : index
    %c0_18 = arith.constant 0 : index
    %29 = vector.load %arg6[%c0_17, %c1, %c0_18] : memref<1x2x128xf32, #tpu.memory_space<vmem>>, vector<1x1x128xf32>
    %30 = vector.shape_cast %29 : vector<1x1x128xf32> to vector<1x128xf32>
    %31 = vector.shape_cast %5 : vector<1x128xf32> to vector<1x1x128xf32>
    tpu.vector_store %arg6[%c0_17, %c1, %c0_18], %31 {strides = array<i32>} : memref<1x2x128xf32, #tpu.memory_space<vmem>>, vector<1x1x128xf32>,
    return
  }
  func.func @transform_0(%arg0: i32) -> i32 {
    %c0_i32 = arith.constant 0 : i32
    %c0_i32_0 = arith.constant 0 : i32
    return %c0_i32 : i32
  }
  func.func @transform_1(%arg0: i32) -> (i32, i32) {
    %c0_i32 = arith.constant 0 : i32
    %c0_i32_0 = arith.constant 0 : i32
    %c0_i32_1 = arith.constant 0 : i32
    return %c0_i32, %c0_i32_0 : i32, i32
  }
  func.func @transform_2(%arg0: i32) -> (i32, i32) {
    %c0_i32 = arith.constant 0 : i32
    %c0_i32_0 = arith.constant 0 : i32
    %c0_i32_1 = arith.constant 0 : i32
    return %c0_i32, %c0_i32_0 : i32, i32
  }
  func.func @transform_3(%arg0: i32) -> (i32, i32) {
    %c0_i32 = arith.constant 0 : i32
    %c0_i32_0 = arith.constant 0 : i32
    %c0_i32_1 = arith.constant 0 : i32
    return %c0_i32, %c0_i32_0 : i32, i32
  }
  func.func @transform_4(%arg0: i32) -> (i32, i32, i32) {
    %c0_i32 = arith.constant 0 : i32
    %c0_i32_0 = arith.constant 0 : i32
    %c0_i32_1 = arith.constant 0 : i32
    return %arg0, %c0_i32, %c0_i32_0 : i32, i32, i32
  }
  func.func @transform_5(%arg0: i32) -> (i32, i32, i32) {
    %c0_i32 = arith.constant 0 : i32
    %c0_i32_0 = arith.constant 0 : i32
    %c0_i32_1 = arith.constant 0 : i32
    return %arg0, %c0_i32, %c0_i32_0 : i32, i32, i32
  }
}

</mosaic_0001>

<bundles_post_ra>
// kernel: estimator_submodule_forward.1
= control target key start
LH: loop header
LB: loop body
LE: loop exit
PB: predicated region body
PF: predicated region fallthrough
CT: control target
= control target key end

     0   :  { %s2236_s20 = smov 0   ;;  %s2311_s0 = inlined_call_operand.<no memory space> [shape: f32[1], index: 0, kind: input, shape index: {}]   ;;  %s2312_s1 = inlined_call_operand.vmem [shape: f32[12,26], index: 1, kind: input, shape index: {}]   ;;  %s2313_s2 = inlined_call_operand.vmem [shape: f32[11,11], index: 2, kind: input, shape index: {}]   ;;  %s2314_s3 = inlined_call_operand.vmem [shape: f32[1,11], index: 3, kind: input, shape index: {}]   ;;  %s2315_s4 = inlined_call_operand.vmem [shape: f32[2,26,128], index: 4, kind: input, shape index: {}]   ;;  %s2316_s5 = inlined_call_operand.vmem [shape: f32[2,2,128], index: 5, kind: output, shape index: {}]  }
   0x1   :  { %10 = sst [smem:[#allocation2]] %s2311_s0 }
   0x2 LB: > { %s1822_s21 = sadd.s32 4294967295, %s2198_s20   ;;  %p1826_p0 = scmp.ge.s32.totalorder %s2198_s20, 1  ;;  %s2198_s20 = sphi %s2236_s20, %s16_s20  }
   0x3   : > { %p188_p1 = scmp.lt.s32.totalorder %s2198_s20, 3 }
   0x5   : > { %p189_p2 = pnand %p1826_p0, %p188_p1 }
   0x6   : > { %p215_p3 = scmp.lt.s32.totalorder (!%p189_p2), %s1822_s21, 1  ;;  %v229_v0 = vld [vmem:[%s2312_s1] sm:$0xff] (!%p189_p2)  ;;  %v230_v1 = vld [vmem:[%s2312_s1 + $0x8] sm:$0xf] (!%p189_p2)  ;;  %vm231_vm0 = vcmask (!%p189_p2), 211968   ;;  %vm238_vm1 = vcmask (!%p189_p2), 1041408  }
   0x7   : > { %192 = sbr.rel (%p189_p2) target bundleno = 813 (0x32d), region = 40  ;;  %v233_v2 = vsel (!%p189_p2), %vm231_vm0, %v229_v0, 0  ;;  %v236_v3 = vsel (!%p189_p2), %vm231_vm0, %v230_v1, 0  ;;  %v777_v47 = vld [vmem:[%s2313_s2] sm:$0xff] (!%p189_p2)  ;;  %vm779_vm2 = vcmask (!%p189_p2), 89088   ;;  %s224_s8 = sld [smem:[#allocation2]] (!%p189_p2) }
   0x8   : > { %v2252_v4 = vand.u32 (!%p189_p2), 4294901760, %v233_v2  ;;  %v2254_v5 = vand.u32 (!%p189_p2), 4294901760, %v236_v3  ;;  %v781_v48 = vsel (!%p189_p2), %vm779_vm2, %v777_v47, 0  ;;  %v778_v54 = vld [vmem:[%s2313_s2 + $0x8] sm:$0x7] (!%p189_p2)  ;;  %vm786_vm4 = vcmask (!%p189_p2), 1042432  }
   0x9   : > { %v857_v49 = vand.u32 (!%p189_p2), 4294901760, %v781_v48  ;;  %v784_v55 = vsel (!%p189_p2), %vm779_vm2, %v778_v54, 0  ;;  %vm2201_vm6 = vmmov (!%p189_p2), 0  }
   0xa   : > { %v312_v6 = vsub.f32 (!%p189_p2), %v233_v2, %v2252_v4  ;;  %v2259_v7 = vsub.f32 (!%p189_p2), %v236_v3, %v2254_v5  ;;  %v867_v56 = vand.u32 (!%p189_p2), 4294901760, %v784_v55 }
   0xb   : > { %v858_v50 = vsub.f32 (!%p189_p2), %v781_v48, %v857_v49 }
   0xc   : > { %v313_v11 = vand.u32 (!%p189_p2), 4294901760, %v312_v6  ;;  %v323_v12 = vand.u32 (!%p189_p2), 4294901760, %v2259_v7  ;;  %v868_v57 = vsub.f32 (!%p189_p2), %v784_v55, %v867_v56 }
   0xd   : > { %v859_v51 = vand.u32 (!%p189_p2), 4294901760, %v858_v50  ;;  %v2282_v58 = vstv (!%p189_p2), %s224_s8 }
   0xe   : > { %s2318_s21 = smov (!%p215_p3, %s1822_s21), 1  ;;  %v314_v18 = vsub.f32 %v312_v6, %v313_v11  ;;  %v324_v24 = vsub.f32 %v2259_v7, %v323_v12  ;;  %v869_v62 = vand.u32 4294901760, %v868_v57 }
   0xf   : > { %s1832_s25 = sshll.u32 %s2318_s21, 5  ;;  %v860_v52 = vsub.f32 %v858_v50, %v859_v51  ;;  %s1829_s9 = sshll.u32 %s2318_s21, 1 }
  0x10   : > { %s219_s28 = scalar_lea.vmem %s2315_s4, %s1832_s25  ;;  %v315_v23 = vand.u32 4294901760, %v314_v18  ;;  %v325_v35 = vand.u32 4294901760, %v324_v24  ;;  %s2287_s12 = scalar_lea.vmem %s2316_s5, %s1829_s9 }
  0x11   : > { %v225_v8 = vld [vmem:[%s219_s28] sm:$0xff]  ;;  %v226_v9 = vld [vmem:[%s219_s28 + $0x8] sm:$0xff]  ;;  %v227_v10 = vld [vmem:[%s219_s28 + $0x10] sm:$0xff]  ;;  %v861_v53 = vand.u32 4294901760, %v860_v52 }
  0x12   : > { %v243_v13 = vand.u32 4294901760, %v225_v8  ;;  %v246_v14 = vand.u32 4294901760, %v226_v9  ;;  %v228_v15 = vld [vmem:[%s219_s28 + $0x18] sm:$0x3]  ;;  %v249_v16 = vand.u32 4294901760, %v227_v10  ;;  %1919 = vmatprep.mubr.f32.mxu0 %v315_v23 }
  0x13   : > { %v240_v17 = vsel %vm238_vm1, %v228_v15, 0  ;;  %1981 = vmatprep.mubr.f32.mxu1 %v861_v53 }
  0x14   : > { %v2061_v19 = vpack.c.bf16 %v246_v14, %v243_v13  ;;  %v252_v20 = vand.u32 4294901760, %v240_v17  ;;  %v333_v21 = vsub.f32 %v225_v8, %v243_v13  ;;  %v340_v22 = vsub.f32 %v226_v9, %v246_v14 }
  0x15   : > { %v347_v25 = vsub.f32 %v227_v10, %v249_v16 }
  0x16   : > { %2062 = vmatprep.subr.bf16.mxu0 %v2061_v19  ;;  %v2065_v26 = vpack.c.bf16 %v252_v20, %v249_v16  ;;  %v334_v27 = vand.u32 4294901760, %v333_v21  ;;  %v341_v28 = vand.u32 4294901760, %v340_v22  ;;  %v354_v29 = vsub.f32 %v240_v17, %v252_v20 }
  0x17   : > { %2064 = vmatpush3.bf16.msra.mxu0 %v2061_v19  ;;  %v348_v30 = vand.u32 4294901760, %v347_v25  ;;  %v2077_v43 = vpack.c.bf16 %v340_v22, %v333_v21  ;;  %v2202_v20 = vmov 0.0  }
  0x18   : > { %2066 = vmatprep.subr.bf16.mxu0 %v2065_v26  ;;  %v335_v31 = vsub.f32 %v333_v21, %v334_v27  ;;  %v342_v32 = vsub.f32 %v340_v22, %v341_v28  ;;  %v355_v33 = vand.u32 4294901760, %v354_v29  ;;  %v2081_v44 = vpack.c.bf16 %v354_v29, %v347_v25  ;;  %v1298_v21 = vld [vmem:[%s2314_s3] sm:$0x1] }
  0x19   : > { %v349_v34 = vsub.f32 %v347_v25, %v348_v30  ;;  %v2093_v45 = vpack.c.bf16 %v341_v28, %v334_v27  ;;  %v1300_v22 = vsel %vm779_vm2, %v1298_v21, 0 }
  0x1a   : > { %v336_v36 = vand.u32 4294901760, %v335_v31  ;;  %v343_v37 = vand.u32 4294901760, %v342_v32  ;;  %v356_v38 = vsub.f32 %v354_v29, %v355_v33  ;;  %v2097_v46 = vpack.c.bf16 %v355_v33, %v348_v30 }
  0x1b   : > { %2068 = vmatpush3.bf16.msra.mxu0 %v2065_v26  ;;  %v350_v39 = vand.u32 4294901760, %v349_v34  ;;  %v1372_v23 = vand.u32 4294901760, %v1300_v22 }
  0x1c   : > { %v2069_v40 = vpack.c.bf16 %v343_v37, %v336_v36  ;;  %v357_v41 = vand.u32 4294901760, %v356_v38 }
  0x1d   : > { %v1373_v24 = vsub.f32 %v1300_v22, %v1372_v23 }
  0x1e   : > { %1920 = vmatmul.mubr.f32.vlgmr.msra.gmra.mrb[0].mxu0 %v325_v35  ;;  %2070 = vmatprep.subr.bf16.mxu0 %v2069_v40  ;;  %v2073_v42 = vpack.c.bf16 %v357_v41, %v350_v39 }
  0x1f   : > { %2072 = vmatpush3.bf16.msra.mxu0 %v2069_v40  ;;  %1930 = vmatprep.mubr.f32.mxu0 %v2252_v4 }
  0x20   : > { %2074 = vmatprep.subr.bf16.mxu0 %v2073_v42 }
  0x23   : > { %2076 = vmatpush3.bf16.msra.mxu0 %v2073_v42 }
  0x24   : > { %2078 = vmatprep.subr.bf16.mxu0 %v2077_v43 }
  0x26   : > { %1931 = vmatmul.mubr.f32.vlgmr.msra.gmra.mrb[0].mxu0 %v2254_v5 }
  0x27   : > { %2080 = vmatpush3.bf16.msra.mxu0 %v2077_v43  ;;  %1941 = vmatprep.mubr.f32.mxu0 %v312_v6 }
  0x28   : > { %2082 = vmatprep.subr.bf16.mxu0 %v2081_v44 }
  0x2b   : > { %2084 = vmatpush3.bf16.msra.mxu0 %v2081_v44 }
  0x2c   : > { %2086 = vmatprep.subr.bf16.mxu0 %v2061_v19 }
  0x2e   : > { %1942 = vmatmul.mubr.f32.vlgmr.msra.gmra.mrb[0].mxu0 %v2259_v7 }
  0x2f   : > { %2088 = vmatpush3.bf16.msra.mxu0 %v2061_v19  ;;  %1952 = vmatprep.mubr.f32.mxu0 %v313_v11 }
  0x30   : > { %2090 = vmatprep.subr.bf16.mxu0 %v2065_v26 }
  0x33   : > { %2092 = vmatpush3.bf16.msra.mxu0 %v2065_v26 }
  0x34   : > { %2094 = vmatprep.subr.bf16.mxu0 %v2093_v45 }
  0x36   : > { %1953 = vmatmul.mubr.f32.vlgmr.msra.gmra.mrb[0].mxu0 %v323_v12 }
  0x37   : > { %2096 = vmatpush3.bf16.msra.mxu0 %v2093_v45  ;;  %1963 = vmatprep.mubr.f32.mxu0 %v2252_v4 }
  0x38   : > { %2098 = vmatprep.subr.bf16.mxu0 %v2097_v46 }
  0x3b   : > { %2100 = vmatpush3.bf16.msra.mxu0 %v2097_v46 }
  0x3c   : > { %2102 = vmatprep.subr.bf16.mxu0 %v2061_v19 }
  0x3e   : > { %1964 = vmatmul.mubr.f32.vlgmr.msra.gmra.mrb[0].mxu0 %v2254_v5 }
  0x3f   : > { %2104 = vmatpush3.bf16.msra.mxu0 %v2061_v19  ;;  %1974 = vmatprep.mubr.f32.mxu0 %v2252_v4  ;;  %v2200_v19 = vmov 0.0|0.0  }
  0x40   : > { %2106 = vmatprep.subr.bf16.mxu0 %v2065_v26 }
  0x43   : > { %2108 = vmatpush3.bf16.msra.mxu0 %v2065_v26  ;;  %v1374_v26 = vand.u32 4294901760, %v1373_v24 }
  0x45   : > { %v1375_v33 = vsub.f32 %v1373_v24, %v1374_v26 }
  0x46   : > { %1975 = vmatmul.mubr.f32.vlgmr.msra.gmra.mrb[0].mxu0 %v2254_v5  ;;  %v870_v5 = vsub.f32 %v868_v57, %v869_v62 }
  0x47   : > { %v1376_v39 = vand.u32 4294901760, %v1375_v33 }
  0x48   : > { %v871_v10 = vand.u32 4294901760, %v870_v5 }
 0x119   : > { %v1976_v59 = vpop.f32.mrb[0].mxu0 }
 0x11a   : > { %vm771_vm3 = vcmp.ge.f32.partialorder %v1976_v59, 0.0  ;;  %v774_v60 = vmul.f32 %v1976_v59, %v2282_v58  ;;  %v760_v61 = vpop.f32.mrb[1].mxu0  ;;  %1768 = vst [vmem:[%s2287_s12 - $0x2] sm:$0x8] %v1976_v59 }
 0x11b   : > { %vm770_vm5 = vcmp.ge.f32.partialorder %v760_v61, 0.0  ;;  %v773_v63 = vmul.f32 %v2282_v58, %v760_v61 }
 0x11c   : > { %v776_v0 = vsel %vm771_vm3, %v1976_v59, %v774_v60 }
 0x11d   : > { %v788_v1 = vsel %vm786_vm4, %v776_v0, 0  ;;  %v775_v2 = vsel %vm770_vm5, %v760_v61, %v773_v63 }
 0x11e   : > { %v791_v3 = vand.u32 4294901760, %v775_v2  ;;  %v794_v4 = vand.u32 4294901760, %v788_v1 }
 0x120   : > { %v2109_v6 = vpack.c.bf16 %v794_v4, %v791_v3  ;;  %v879_v7 = vsub.f32 %v775_v2, %v791_v3  ;;  %v886_v8 = vsub.f32 %v788_v1, %v794_v4 }
 0x122   : > { %v880_v9 = vand.u32 4294901760, %v879_v7  ;;  %2110 = vmatprep.subr.bf16.mxu1 %v2109_v6  ;;  %v887_v11 = vand.u32 4294901760, %v886_v8  ;;  %v2117_v12 = vpack.c.bf16 %v886_v8, %v879_v7 }
 0x123   : > { %2112 = vmatpush3.bf16.msra.mxu1 %v2109_v6 }
 0x124   : > { %v881_v13 = vsub.f32 %v879_v7, %v880_v9  ;;  %v888_v14 = vsub.f32 %v886_v8, %v887_v11  ;;  %v2125_v15 = vpack.c.bf16 %v887_v11, %v880_v9 }
 0x126   : > { %1982 = vmatmul.mubr.f32.vlgmr.msra.gmra.mrb[0].mxu1 %v871_v10  ;;  %v882_v16 = vand.u32 4294901760, %v881_v13  ;;  %v889_v17 = vand.u32 4294901760, %v888_v14 }
 0x127   : > { %1988 = vmatprep.mubr.f32.mxu1 %v857_v49 }
 0x128   : > { %v2113_v18 = vpack.c.bf16 %v889_v17, %v882_v16 }
 0x12a   : > { %2114 = vmatprep.subr.bf16.mxu1 %v2113_v18 }
 0x12b   : > { %2116 = vmatpush3.bf16.msra.mxu1 %v2113_v18 }
 0x12c   : > { %2118 = vmatprep.subr.bf16.mxu1 %v2117_v12 }
 0x12e   : > { %1989 = vmatmul.mubr.f32.vlgmr.msra.gmra.mrb[0].mxu1 %v867_v56 }
 0x12f   : > { %2120 = vmatpush3.bf16.msra.mxu1 %v2117_v12  ;;  %1995 = vmatprep.mubr.f32.mxu1 %v858_v50 }
 0x130   : > { %2122 = vmatprep.subr.bf16.mxu1 %v2109_v6 }
 0x136   : > { %1996 = vmatmul.mubr.f32.vlgmr.msra.gmra.mrb[0].mxu1 %v868_v57 }
 0x137   : > { %2124 = vmatpush3.bf16.msra.mxu1 %v2109_v6  ;;  %2002 = vmatprep.mubr.f32.mxu1 %v859_v51 }
 0x138   : > { %2126 = vmatprep.subr.bf16.mxu1 %v2125_v15 }
 0x13e   : > { %2003 = vmatmul.mubr.f32.vlgmr.msra.gmra.mrb[0].mxu1 %v869_v62 }
 0x13f   : > { %2128 = vmatpush3.bf16.msra.mxu1 %v2125_v15  ;;  %2009 = vmatprep.mubr.f32.mxu1 %v857_v49 }
 0x140   : > { %2130 = vmatprep.subr.bf16.mxu1 %v2109_v6 }
 0x146   : > { %2010 = vmatmul.mubr.f32.vlgmr.msra.gmra.mrb[0].mxu1 %v867_v56 }
 0x147   : > { %2132 = vmatpush3.bf16.msra.mxu1 %v2109_v6  ;;  %2016 = vmatprep.mubr.f32.mxu1 %v857_v49 }
 0x148   : > { %2133 = vmatprep.subr.bf16.mxu1 %v2200_v19 }
 0x14e   : > { %2017 = vmatmul.mubr.f32.vlgmr.msra.gmra.mrb[0].mxu1 %v867_v56 }
 0x14f   : > { %2023 = vmatprep.mubr.msk.f32.mxu1 %vm2201_vm6, %v2202_v20 }
 0x221   : > { %v2018_v25 = vpop.f32.mrb[0].mxu1 }
 0x222   : > { %vm1293_vm7 = vcmp.ge.f32.partialorder %v2018_v25, 0.0  ;;  %v1295_v27 = vmul.f32 %v2018_v25, %v2282_v58  ;;  %v1282_v28 = vpop.f32.mrb[1].mxu1 }
 0x223   : > { %vm1292_vm8 = vcmp.ge.f32.partialorder %v1282_v28, 0.0  ;;  %v1294_v29 = vmul.f32 %v1282_v28, %v2282_v58 }
 0x224   : > { %v1297_v30 = vsel %vm1293_vm7, %v2018_v25, %v1295_v27 }
 0x225   : > { %v1303_v31 = vsel %vm786_vm4, %v1297_v30, 0  ;;  %v1296_v32 = vsel %vm1292_vm8, %v1282_v28, %v1294_v29 }
 0x226   : > { %v1309_v34 = vand.u32 4294901760, %v1303_v31  ;;  %v1306_v35 = vand.u32 4294901760, %v1296_v32 }
 0x228   : > { %v1391_v36 = vsub.f32 %v1303_v31, %v1309_v34  ;;  %v2134_v37 = vpack.c.bf16 %v1309_v34, %v1306_v35  ;;  %v1384_v38 = vsub.f32 %v1296_v32, %v1306_v35 }
 0x22a   : > { %v1392_v40 = vand.u32 4294901760, %v1391_v36  ;;  %v1385_v41 = vand.u32 4294901760, %v1384_v38  ;;  %2135 = vmatpush3.bf16.msra.mxu1 %v2134_v37  ;;  %v2140_v42 = vpack.c.bf16 %v1391_v36, %v1384_v38 }
 0x22b   : > { %2136 = vmatprep.subr.bf16.mxu1 %v2200_v19 }
 0x22c   : > { %v1386_v43 = vsub.f32 %v1384_v38, %v1385_v41  ;;  %v1393_v44 = vsub.f32 %v1391_v36, %v1392_v40  ;;  %v2146_v45 = vpack.c.bf16 %v1392_v40, %v1385_v41 }
 0x22d   : > { %2024 = vmatmul.mubr.f32.vlgmr.msra.gmra.mrb[2].mxu1 %v1376_v39 }
 0x22e   : > { %v1387_v46 = vand.u32 4294901760, %v1386_v43  ;;  %v1394_v47 = vand.u32 4294901760, %v1393_v44  ;;  %2030 = vmatprep.mubr.msk.f32.mxu1 %vm2201_vm6, %v2202_v20 }
 0x230   : > { %v2137_v48 = vpack.c.bf16 %v1394_v47, %v1387_v46 }
 0x232   : > { %2138 = vmatpush3.bf16.msra.mxu1 %v2137_v48 }
 0x233   : > { %2139 = vmatprep.subr.bf16.mxu1 %v2200_v19 }
 0x235   : > { %2031 = vmatmul.mubr.f32.vlgmr.msra.gmra.mrb[2].mxu1 %v1372_v23 }
 0x236   : > { %2141 = vmatpush3.bf16.msra.mxu1 %v2140_v42  ;;  %2037 = vmatprep.mubr.msk.f32.mxu1 %vm2201_vm6, %v2202_v20 }
 0x237   : > { %2142 = vmatprep.subr.bf16.mxu1 %v2200_v19 }
 0x23d   : > { %2038 = vmatmul.mubr.f32.vlgmr.msra.gmra.mrb[2].mxu1 %v1373_v24 }
 0x23e   : > { %2144 = vmatpush3.bf16.msra.mxu1 %v2134_v37  ;;  %2044 = vmatprep.mubr.msk.f32.mxu1 %vm2201_vm6, %v2202_v20 }
 0x23f   : > { %2145 = vmatprep.subr.bf16.mxu1 %v2200_v19 }
 0x245   : > { %2045 = vmatmul.mubr.f32.vlgmr.msra.gmra.mrb[2].mxu1 %v1374_v26 }
 0x246   : > { %2147 = vmatpush3.bf16.msra.mxu1 %v2146_v45  ;;  %2051 = vmatprep.mubr.msk.f32.mxu1 %vm2201_vm6, %v2202_v20 }
 0x247   : > { %2148 = vmatprep.subr.bf16.mxu1 %v2200_v19 }
 0x24d   : > { %2052 = vmatmul.mubr.f32.vlgmr.msra.gmra.mrb[2].mxu1 %v1372_v23 }
 0x24e   : > { %2150 = vmatpush3.bf16.msra.mxu1 %v2134_v37  ;;  %2058 = vmatprep.mubr.msk.f32.mxu1 %vm2201_vm6, %v2202_v20 }
 0x255   : > { %2059 = vmatmul.mubr.f32.vlgmr.msra.gmra.mrb[2].mxu1 %v1372_v23 }
 0x328   : > { %v1760_v49 = vpop.f32.mrb[2].mxu1 }
 0x329   : > { %vm1764_vm9 = vcmp.ge.f32.partialorder %v1760_v49, 0.0  ;;  %v1765_v50 = vmul.f32 %v1760_v49, %v2282_v58  ;;  %v2060_v51 = vpop.f32.mrb[3].mxu1 }
 0x32b   : > { %v1766_v52 = vsel %vm1764_vm9, %v1760_v49, %v1765_v50 }
 0x32c   : > { %1767 = vst [vmem:[%s2287_s12] sm:$0x1] %v1766_v52 }
 0x32d PF: > { %s16_s20 = sadd.s32 1, %s2198_s20  }
 0x32e   : > { %p13_p4 = scmp.ge.s32.totalorder %s16_s20, 4  }
 0x330   :  { %15 = sbr.rel (!%p13_p4) target bundleno = 2 (0x2), region = 70 }

</bundles_post_ra>
